<compile_context>
chip_gen: v6e
topology: v6e:2x2x1
jax: 0.10.0
libtpu: 0.0.40
codegen_flags: <defaults>
</compile_context>

<pallas_src>
import jax
import jax.numpy as jnp
from jax.experimental import pallas as pl
from jax.experimental.pallas import tpu as pltpu


# ---------------------------------------------------------------------------
# Kernel: 3 fused MXU matmuls covering every agent head at once.
# ---------------------------------------------------------------------------
def qnet_kernel(x_ref, w1_ref, b1_ref, w2_ref, b2_ref, w3_ref, b3_ref, out_ref):
    # x_ref:  (Bt, D_in)                         f32
    # w1_ref: (D_in, A*H1)                       bf16 (or f32)
    # b1_ref: (1, A*H1)                          f32
    # w2_ref: (A*H1, A*H2)  block-diagonal       bf16 (or f32)
    # b2_ref: (1, A*H2)                          f32
    # w3_ref: (A*H2, 128)   block-column, padded bf16 (or f32)
    # b3_ref: (1, 128)      zero-padded          f32
    # out_ref:(Bt, 128)     lane-dense output    f32
    mm_dtype = w1_ref.dtype

    x = x_ref[...].astype(mm_dtype)
    h1 = jnp.dot(x, w1_ref[...], preferred_element_type=jnp.float32)
    h1 = jnp.maximum(h1 + b1_ref[...], 0.0)                          # f32 (Bt, A*H1)

    h2 = jnp.dot(h1.astype(mm_dtype), w2_ref[...],
                 preferred_element_type=jnp.float32)
    h2 = jnp.maximum(h2 + b2_ref[...], 0.0)                          # f32 (Bt, A*H2)

    q = jnp.dot(h2.astype(mm_dtype), w3_ref[...],
                preferred_element_type=jnp.float32) + b3_ref[...]    # f32 (Bt, 128)
    out_ref[...] = q.astype(out_ref.dtype)


# ---------------------------------------------------------------------------
# Batch-tile selection: >=2 tiles when possible (v7x megacore), <=512 rows,
# aligned to 16 (bf16 sublane packing) or 8 (f32).
# ---------------------------------------------------------------------------
def _pick_block_b(batch, use_bf16):
    align = 16 if use_bf16 else 8
    if batch <= align:
        return batch
    cap = 512
    limit = min(cap, batch // 2) if batch >= 2 * align else min(cap, batch)
    bb = (limit // align) * align
    while bb >= align:
        if batch % bb == 0:
            return bb
        bb -= align
    return batch  # fallback: single whole-batch tile


# ---------------------------------------------------------------------------
# Host-side wrapper.
# ---------------------------------------------------------------------------
def qnet_forward(obs, action, packed_params, num_agents, block_b=None):
    """obs: (B, A, obs_feat), action: (B, A, act_feat) -> (B, A) Q-values."""
    B = obs.shape[0]
    # Fold the obs/action concat on the host: one K=48 matmul in the kernel.
    x = jnp.concatenate([obs.reshape(B, -1), action.reshape(B, -1)],
                        axis=1).astype(jnp.float32)                   # (B, D_in)

    w1, b1, w2, b2, w3, b3 = packed_params
    d_in, n1 = w1.shape
    n2 = w2.shape[1]
    n_out = w3.shape[1]                       # padded to a multiple of 128
    use_bf16 = (w1.dtype == jnp.bfloat16)

    if block_b is None:
        block_b = _pick_block_b(B, use_bf16)
    assert B % block_b == 0, "batch must be divisible by the batch tile"
    assert block_b == B or block_b % 8 == 0, "batch tile must be 8-aligned"
    grid = (B // block_b,)

    # Weights are grid-resident: index_map ignores the batch axis.
    weight_spec = lambda shape: pl.BlockSpec(shape, lambda i: (0, 0))

    out = pl.pallas_call(
        qnet_kernel,
        out_shape=jax.ShapeDtypeStruct((B, n_out), jnp.float32),
        grid=grid,
        in_specs=[
            pl.BlockSpec((block_b, d_in), lambda i: (i, 0)),   # x (tiled on batch)
            weight_spec((d_in, n1)),                           # w1
            weight_spec((1, n1)),                              # b1
            weight_spec((n1, n2)),                             # w2 (block-diag)
            weight_spec((1, n2)),                              # b2
            weight_spec((n2, n_out)),                          # w3 (padded block-col)
            weight_spec((1, n_out)),                           # b3 (padded)
        ],
        out_specs=pl.BlockSpec((block_b, n_out), lambda i: (i, 0)),
        compiler_params=pltpu.CompilerParams(
            dimension_semantics=("parallel",)),
    )(x, w1, b1, w2, b2, w3, b3)

    return out[:, :num_agents]                                  # drop padded lanes


# ---------------------------------------------------------------------------
# Parameter init (per-agent, PyTorch-like) and host-side packing.
# ---------------------------------------------------------------------------
def init_params(key, num_agents, d_in, h1=128, h2=64):
    ks = jax.random.split(key, 6)
    w1 = jax.random.normal(ks[0], (num_agents, d_in, h1), jnp.float32) * 0.05
    b1 = jax.random.normal(ks[1], (num_agents, h1), jnp.float32) * 0.05
    w2 = jax.random.normal(ks[2], (num_agents, h1, h2), jnp.float32) * 0.05
    b2 = jax.random.normal(ks[3], (num_agents, h2), jnp.float32) * 0.05
    w3 = jax.random.normal(ks[4], (num_agents, h2), jnp.float32) * 0.05
    b3 = jax.random.normal(ks[5], (num_agents,), jnp.float32) * 0.05
    return (w1, b1, w2, b2, w3, b3)


def pack_params(params, weight_dtype=jnp.bfloat16):
    """Fuse all agent heads into wide / block-diagonal matrices (done once,
    host-side).  Layer-3 weight/bias are zero-padded to 128 output lanes."""
    w1, b1, w2, b2, w3, b3 = params
    num_agents, d_in, h1 = w1.shape
    h2 = w2.shape[2]
    n_out = max(128, -(-num_agents // 128) * 128)   # lane-dense output width

    # Layer 1: stack along N -> (D_in, A*H1).
    w1_cat = jnp.transpose(w1, (1, 0, 2)).reshape(d_in, num_agents * h1)
    b1_cat = b1.reshape(1, num_agents * h1)

    # Layer 2: block-diagonal (A*H1, A*H2) keeps agents independent.
    eye = jnp.eye(num_agents, dtype=jnp.float32)
    w2_bd = jnp.einsum("aij,ab->aibj", w2, eye).reshape(num_agents * h1,
                                                        num_agents * h2)
    b2_cat = b2.reshape(1, num_agents * h2)

    # Layer 3: block-column (A*H2, A), zero-padded to (A*H2, n_out).
    w3_bd = jnp.einsum("ah,ab->ahb", w3, eye).reshape(num_agents * h2, num_agents)
    w3_pad = jnp.zeros((num_agents * h2, n_out), jnp.float32).at[:, :num_agents].set(w3_bd)
    b3_pad = jnp.zeros((1, n_out), jnp.float32).at[0, :num_agents].set(b3)

    # Weights in bf16 for the MXU; biases stay f32 (VPU add / ReLU in f32).
    return (w1_cat.astype(weight_dtype), b1_cat,
            w2_bd.astype(weight_dtype), b2_cat,
            w3_pad.astype(weight_dtype), b3_pad)


# ---------------------------------------------------------------------------
# Pure-JAX reference mirroring the PyTorch per-agent forward (f32).
# ---------------------------------------------------------------------------
def qnet_reference(obs, action, params):
    B = obs.shape[0]
    x = jnp.concatenate([obs.reshape(B, -1), action.reshape(B, -1)], axis=1)
    w1, b1, w2, b2, w3, b3 = params
    outs = []
    for a in range(w1.shape[0]):
        h = jnp.maximum(x @ w1[a] + b1[a], 0.0)
        h = jnp.maximum(h @ w2[a] + b2[a], 0.0)
        outs.append(h @ w3[a] + b3[a])          # (B,)
    return jnp.stack(outs, axis=1)              # (B, A)


if __name__ == "__main__":
    # Module geometry: 4 agents; total_obs = sum(per-agent obs) + A*(A-1)
    #   = 20 + 12 = 32 -> obs carries (B, 4, 8); total_action = 16 -> (B, 4, 4).
    # D_in = 48, per-agent hidden sizes 128 -> 64 -> 1.
    num_agents = 4
    batch = 32                         # default tile picker -> block_b=16, 2 tiles
    obs_feat = 8
    act_feat = 4
    d_obs = num_agents * obs_feat      # 32
    d_act = num_agents * act_feat      # 16
    d_in = d_obs + d_act               # 48

    key = jax.random.PRNGKey(0)
    k_obs, k_act, k_par = jax.random.split(key, 3)
    obs = jax.random.normal(k_obs, (batch, num_agents, obs_feat), jnp.float32)
    action = jax.random.normal(k_act, (batch, num_agents, act_feat), jnp.float32)

    params = init_params(k_par, num_agents, d_in)
    packed = pack_params(params, weight_dtype=jnp.bfloat16)

    out = jax.block_until_ready(qnet_forward(obs, action, packed, num_agents))

    ref = qnet_reference(obs, action, params)
    assert out.shape == (batch, num_agents)
    # bf16 MXU inputs, f32 accumulation / bias / ReLU -> ~1e-2 tolerance.
    assert jnp.allclose(out, ref, atol=1e-2, rtol=1e-2), "mismatch vs reference"

    print("KERNEL_OK")
</pallas_src>

<mosaic_0001>
module attributes {stable_mosaic.version = 11 : i64} {
  func.func @qnet_kernel(%arg0: i32, %arg1: memref<16x48xf32, #tpu.memory_space<vmem>>, %arg2: memref<48x512xbf16, #tpu.memory_space<vmem>>, %arg3: memref<1x512xf32, #tpu.memory_space<vmem>>, %arg4: memref<512x256xbf16, #tpu.memory_space<vmem>>, %arg5: memref<1x256xf32, #tpu.memory_space<vmem>>, %arg6: memref<256x128xbf16, #tpu.memory_space<vmem>>, %arg7: memref<1x128xf32, #tpu.memory_space<vmem>>, %arg8: memref<16x128xf32, #tpu.memory_space<vmem>>) attributes {dimension_semantics = [#tpu.dimension_semantics<parallel>], iteration_bounds = array<i64: 2>, scalar_prefetch = 0 : i64, scratch_operands = 0 : i64, tpu.core_type = #tpu.core_type<tc>, window_params = [{transform_indices = @transform_0, window_bounds = array<i64: 16, 48>}, {pipeline_mode = #tpu.pipeline_mode<synchronous>, transform_indices = @transform_1, window_bounds = array<i64: 48, 512>}, {pipeline_mode = #tpu.pipeline_mode<synchronous>, transform_indices = @transform_2, window_bounds = array<i64: 1, 512>}, {pipeline_mode = #tpu.pipeline_mode<synchronous>, transform_indices = @transform_3, window_bounds = array<i64: 512, 256>}, {pipeline_mode = #tpu.pipeline_mode<synchronous>, transform_indices = @transform_4, window_bounds = array<i64: 1, 256>}, {pipeline_mode = #tpu.pipeline_mode<synchronous>, transform_indices = @transform_5, window_bounds = array<i64: 256, 128>}, {pipeline_mode = #tpu.pipeline_mode<synchronous>, transform_indices = @transform_6, window_bounds = array<i64: 1, 128>}, {transform_indices = @transform_7, window_bounds = array<i64: 16, 128>}]} {
    %c0 = arith.constant 0 : index
    %c0_0 = arith.constant 0 : index
    %0 = vector.load %arg1[%c0, %c0_0] : memref<16x48xf32, #tpu.memory_space<vmem>>, vector<16x48xf32>
    %1 = arith.truncf %0 : vector<16x48xf32> to vector<16x48xbf16>
    %c0_1 = arith.constant 0 : index
    %c0_2 = arith.constant 0 : index
    %2 = vector.load %arg2[%c0_1, %c0_2] : memref<48x512xbf16, #tpu.memory_space<vmem>>, vector<48x512xbf16>
    %cst = arith.constant dense<0.000000e+00> : vector<16x512xf32>
    %3 = tpu.matmul %1, %2, %cst {dimension_numbers = #tpu.dot_dimension_numbers<[1], [0], [0], [1], [0, 0, 1, 1], [], []>} : vector<16x48xbf16>, vector<48x512xbf16>, vector<16x512xf32> -> vector<16x512xf32>
    %c0_3 = arith.constant 0 : index
    %c0_4 = arith.constant 0 : index
    %4 = vector.load %arg3[%c0_3, %c0_4] : memref<1x512xf32, #tpu.memory_space<vmem>>, vector<1x512xf32>
    %5 = vector.broadcast %4 : vector<1x512xf32> to vector<16x512xf32>
    %6 = arith.addf %3, %5 : vector<16x512xf32>
    %cst_5 = arith.constant 0.000000e+00 : f32
    %7 = vector.broadcast %cst_5 : f32 to vector<16x512xf32>
    %8 = arith.maximumf %6, %7 : vector<16x512xf32>
    %9 = arith.truncf %8 : vector<16x512xf32> to vector<16x512xbf16>
    %c0_6 = arith.constant 0 : index
    %c0_7 = arith.constant 0 : index
    %10 = vector.load %arg4[%c0_6, %c0_7] : memref<512x256xbf16, #tpu.memory_space<vmem>>, vector<512x256xbf16>
    %cst_8 = arith.constant dense<0.000000e+00> : vector<16x256xf32>
    %11 = tpu.matmul %9, %10, %cst_8 {dimension_numbers = #tpu.dot_dimension_numbers<[1], [0], [0], [1], [0, 0, 1, 1], [], []>} : vector<16x512xbf16>, vector<512x256xbf16>, vector<16x256xf32> -> vector<16x256xf32>
    %c0_9 = arith.constant 0 : index
    %c0_10 = arith.constant 0 : index
    %12 = vector.load %arg5[%c0_9, %c0_10] : memref<1x256xf32, #tpu.memory_space<vmem>>, vector<1x256xf32>
    %13 = vector.broadcast %12 : vector<1x256xf32> to vector<16x256xf32>
    %14 = arith.addf %11, %13 : vector<16x256xf32>
    %cst_11 = arith.constant 0.000000e+00 : f32
    %15 = vector.broadcast %cst_11 : f32 to vector<16x256xf32>
    %16 = arith.maximumf %14, %15 : vector<16x256xf32>
    %17 = arith.truncf %16 : vector<16x256xf32> to vector<16x256xbf16>
    %c0_12 = arith.constant 0 : index
    %c0_13 = arith.constant 0 : index
    %18 = vector.load %arg6[%c0_12, %c0_13] : memref<256x128xbf16, #tpu.memory_space<vmem>>, vector<256x128xbf16>
    %cst_14 = arith.constant dense<0.000000e+00> : vector<16x128xf32>
    %19 = tpu.matmul %17, %18, %cst_14 {dimension_numbers = #tpu.dot_dimension_numbers<[1], [0], [0], [1], [0, 0, 1, 1], [], []>} : vector<16x256xbf16>, vector<256x128xbf16>, vector<16x128xf32> -> vector<16x128xf32>
    %c0_15 = arith.constant 0 : index
    %c0_16 = arith.constant 0 : index
    %20 = vector.load %arg7[%c0_15, %c0_16] : memref<1x128xf32, #tpu.memory_space<vmem>>, vector<1x128xf32>
    %21 = vector.broadcast %20 : vector<1x128xf32> to vector<16x128xf32>
    %22 = arith.addf %19, %21 : vector<16x128xf32>
    %c0_17 = arith.constant 0 : index
    %c0_18 = arith.constant 0 : index
    %23 = vector.load %arg8[%c0_17, %c0_18] : memref<16x128xf32, #tpu.memory_space<vmem>>, vector<16x128xf32>
    tpu.vector_store %arg8[%c0_17, %c0_18], %22 {strides = array<i32>} : memref<16x128xf32, #tpu.memory_space<vmem>>, vector<16x128xf32>,
    return
  }
  func.func @transform_0(%arg0: i32) -> (i32, i32) {
    %c0_i32 = arith.constant 0 : i32
    %c0_i32_0 = arith.constant 0 : i32
    return %arg0, %c0_i32 : i32, i32
  }
  func.func @transform_1(%arg0: i32) -> (i32, i32) {
    %c0_i32 = arith.constant 0 : i32
    %c0_i32_0 = arith.constant 0 : i32
    %c0_i32_1 = arith.constant 0 : i32
    return %c0_i32, %c0_i32_0 : i32, i32
  }
  func.func @transform_2(%arg0: i32) -> (i32, i32) {
    %c0_i32 = arith.constant 0 : i32
    %c0_i32_0 = arith.constant 0 : i32
    %c0_i32_1 = arith.constant 0 : i32
    return %c0_i32, %c0_i32_0 : i32, i32
  }
  func.func @transform_3(%arg0: i32) -> (i32, i32) {
    %c0_i32 = arith.constant 0 : i32
    %c0_i32_0 = arith.constant 0 : i32
    %c0_i32_1 = arith.constant 0 : i32
    return %c0_i32, %c0_i32_0 : i32, i32
  }
  func.func @transform_4(%arg0: i32) -> (i32, i32) {
    %c0_i32 = arith.constant 0 : i32
    %c0_i32_0 = arith.constant 0 : i32
    %c0_i32_1 = arith.constant 0 : i32
    return %c0_i32, %c0_i32_0 : i32, i32
  }
  func.func @transform_5(%arg0: i32) -> (i32, i32) {
    %c0_i32 = arith.constant 0 : i32
    %c0_i32_0 = arith.constant 0 : i32
    %c0_i32_1 = arith.constant 0 : i32
    return %c0_i32, %c0_i32_0 : i32, i32
  }
  func.func @transform_6(%arg0: i32) -> (i32, i32) {
    %c0_i32 = arith.constant 0 : i32
    %c0_i32_0 = arith.constant 0 : i32
    %c0_i32_1 = arith.constant 0 : i32
    return %c0_i32, %c0_i32_0 : i32, i32
  }
  func.func @transform_7(%arg0: i32) -> (i32, i32) {
    %c0_i32 = arith.constant 0 : i32
    %c0_i32_0 = arith.constant 0 : i32
    return %arg0, %c0_i32 : i32, i32
  }
}

</mosaic_0001>

<bundles_post_ra>
// kernel: tpu_custom_call.1
= control target key start
LH: loop header
LB: loop body
LE: loop exit
PB: predicated region body
PF: predicated region fallthrough
CT: control target
= control target key end

     0   :  { %s2214_s0 = inlined_call_operand.hbm [shape: f32[32,48], index: 0, kind: input, shape index: {}]   ;;  %s2215_s1 = inlined_call_operand.hbm [shape: bf16[48,512], index: 1, kind: input, shape index: {}]   ;;  %s2216_s2 = inlined_call_operand.hbm [shape: f32[1,512], index: 2, kind: input, shape index: {}]   ;;  %s2217_s3 = inlined_call_operand.hbm [shape: bf16[512,256], index: 3, kind: input, shape index: {}]   ;;  %s2218_s4 = inlined_call_operand.vmem [shape: f32[1,256], index: 4, kind: input, shape index: {}]   ;;  %s2219_s5 = inlined_call_operand.hbm [shape: bf16[256,128], index: 5, kind: input, shape index: {}]   ;;  %s2220_s6 = inlined_call_operand.vmem [shape: f32[1,128], index: 6, kind: input, shape index: {}]   ;;  %s2221_s7 = inlined_call_operand.hbm [shape: f32[32,128], index: 7, kind: output, shape index: {}]  }
   0x1   :  { %2228 = sst [smem:[#allocation16_spill]] %s2215_s1 }
   0x2   :  { %12 = vsyncpa [#allocation3], 0 }
   0x3   :  { %14 = vsyncpa [#allocation3 + $0x1], 0 }
   0x4   :  { %15 = vsyncpa [#allocation6], 0 }
   0x5   :  { %16 = vsyncpa [#allocation9], 0 }
   0x6   :  { %17 = vsyncpa [#allocation4], 0 }
   0x7   :  { %19 = vsyncpa [#allocation4 + $0x1], 0  ;;  %s1974_s24 = smov 0   ;;  %s1976_s25 = smov 0  }
   0x8   :  { %s1978_s26 = smov 0   ;;  %s1980_s27 = smov 0  }
   0x9 LB: > { %s1995_s28 = sadd.s32 4294967295, %s1917_s27   ;;  %s1346_s29 = sadd.s32 4294967294, %s1917_s27   ;;  %s1917_s27 = sphi %s1980_s27, %s2251_s27   ;;  %s1913_s26 = sphi %s1978_s26, %s2250_s26   ;;  %s1909_s25 = sphi %s1976_s25, %s2249_s25   ;;  %s1905_s24 = sphi %s1974_s24, %s2248_s24  }
   0xa   : > { %p45_p0 = scmp.ne.s32.totalorder %s1909_s25, %s1905_s24  ;;  %p2222_p1 = scmp.eq.s32.totalorder %s1995_s28, 0 }
   0xb   : > { %p201_p3 = scmp.eq.s32.totalorder %s1346_s29, 1  ;;  %p1347_p5 = scmp.ge.s32.totalorder %s1917_s27, 1 }
   0xc   : > { %p2004_p4 = por %p2222_p1, %p45_p0  ;;  %p208_p7 = scmp.lt.s32.totalorder %s1917_s27, 3 }
   0xd   : > { %p2009_p6 = por %p201_p3, %p45_p0  ;;  %s1919_s10 = smov [#allocation5]  }
   0xe   : > { %s2229_s30 = scalar_select %p2004_p4, 1, 0 }
   0xf   : > { %s2230_s8 = scalar_select %p2009_p6, 1, 0 }
  0x10   : > { %p2014_p8 = pnand %p1347_p5, %p208_p7  ;;  %s220_s11 = sshll.u32 %s1919_s10, 4  ;;  %s221_s11 = int_to_ptr.vmem [resolvable:$true] %s220_s11 }
  0x11   : > { %s1920_s13 = smov [#allocation8]   ;;  %s1724_s15 = scalar_lea.vmem %s221_s11, 1536 }
  0x12   : > { %s2231_s9 = scalar_select %p2014_p8, 1, 0 }
  0x13   : > { %p1507_p9 = pneg %p2014_p8  ;;  %s244_s14 = sshll.u32 %s1920_s13, 4  ;;  %s245_s14 = int_to_ptr.vmem [resolvable:$true] %s244_s14 }
  0x14   : > { %p1725_p13 = scmp.ne.s32.totalorder %s221_s11, %s1724_s15  ;;  %p1732_p5 = scmp.lt.s32.totalorder %s221_s11, %s221_s11 }
  0x15   : > { %p2023_p11 = pnand %p1507_p9, %p2222_p1  ;;  %p1733_p7 = scmp.lt.s32.totalorder %s1724_s15, %s1724_s15 }
  0x17   : > { %p1715_p12 = pneg %p2023_p11  ;;  %p1734_p10 = por %p1733_p7, %p1732_p5 }
  0x19   : > { %p1727_p0 = pnand %p1725_p13, %p1715_p12 }
  0x1b   : > { %p1728_p3 = pneg %p1727_p0 }
  0x1d   : > { %p1735_p9 = pnand %p1734_p10, %p1728_p3 }
  0x1f   : > { %1738 = shalt.err (!%p1735_p9)
}
  0x20   : > { %s1921_s16 = smov 256   ;;  %s1922_s17 = smov 16  }
  0x21   : > { %s2233_s1 = sld [smem:[#allocation16_spill]]  ;;  %s1750_s20 = scalar_lea.vmem %s245_s14, 8192 }
  0x22   : > { %p1751_p1 = scmp.ne.s32.totalorder %s245_s14, %s1750_s20  ;;  %p1758_p2 = scmp.lt.s32.totalorder %s245_s14, %s245_s14 }
  0x23   : > { %p1759_p6 = scmp.lt.s32.totalorder %s1750_s20, %s1750_s20 }
  0x24   : > { %p1753_p13 = pnand %p1751_p1, %p1715_p12 }
  0x25   : > { %p1760_p5 = por %p1759_p6, %p1758_p2 }
  0x26   : > { %p1754_p0 = pneg %p1753_p13 }
  0x27   : > { %1510 = dma.hbm_to_vmem [thread:$0]  (!%p2023_p11), %s2233_s1, 1536, %s221_s11, [#allocation6], %s1921_s16, %s1921_s16, %s1922_s17  }
  0x28   : > { %p1761_p10 = pnand %p1760_p5, %p1754_p0 }
  0x2a   : > { %1764 = shalt.err (!%p1761_p10)
}
  0x2b   : > { %s2225_s21 = smov 128   ;;  %s2226_s22 = smov 8  }
  0x2c   : > { %1516 = dma.hbm_to_vmem [thread:$0]  (!%p2023_p11), %s2217_s3, 8192, %s245_s14, [#allocation9], %s2225_s21, %s2225_s21, %s2226_s22  }
  0x2d   : > { %s1925_s10 = smov [#allocation7]   ;;  %s1926_s13 = smov [#allocation10]  }
  0x2e   : > { %s234_s11 = sshll.u32 %s1925_s10, 4  ;;  %s260_s15 = sshll.u32 %s1926_s13, 4  ;;  %s235_s11 = int_to_ptr.vmem [resolvable:$true] %s234_s11  ;;  %s261_s15 = int_to_ptr.vmem [resolvable:$true] %s260_s15 }
  0x2f   : > { %s1776_s16 = scalar_lea.vmem %s235_s11, 64  ;;  %p1784_p3 = scmp.lt.s32.totalorder %s235_s11, %s235_s11 }
  0x30   : > { %p1777_p1 = scmp.ne.s32.totalorder %s235_s11, %s1776_s16  ;;  %p1785_p7 = scmp.lt.s32.totalorder %s1776_s16, %s1776_s16 }
  0x32   : > { %p1779_p2 = pnand %p1777_p1, %p1715_p12  ;;  %p1786_p9 = por %p1785_p7, %p1784_p3 }
  0x34   : > { %p1780_p6 = pneg %p1779_p2 }
  0x36   : > { %p1787_p13 = pnand %p1786_p9, %p1780_p6 }
  0x38   : > { %1790 = shalt.err (!%p1787_p13)
}
  0x39   : > { %1513 = dma.hbm_to_vmem [thread:$0]  (!%p2023_p11), %s2216_s2, 64, %s235_s11, [#allocation6]  }
  0x3a   : > { %s1802_s18 = scalar_lea.vmem %s261_s15, 2048  ;;  %p1810_p1 = scmp.lt.s32.totalorder %s261_s15, %s261_s15 }
  0x3b   : > { %p1803_p0 = scmp.ne.s32.totalorder %s261_s15, %s1802_s18  ;;  %p1811_p2 = scmp.lt.s32.totalorder %s1802_s18, %s1802_s18 }
  0x3d   : > { %p1805_p5 = pnand %p1803_p0, %p1715_p12  ;;  %p1812_p4 = por %p1811_p2, %p1810_p1 }
  0x3f   : > { %p1806_p10 = pneg %p1805_p5 }
  0x41   : > { %p1813_p8 = pnand %p1812_p4, %p1806_p10 }
  0x43   : > { %1816 = shalt.err (!%p1813_p8)
}
  0x44   : > { %s1927_s19 = smov 64   ;;  %s1928_s20 = smov 4  }
  0x45   : > { %1519 = dma.hbm_to_vmem [thread:$0]  (!%p2023_p11), %s2219_s5, 2048, %s261_s15, [#allocation9], %s1927_s19, %s1927_s19, %s1928_s20  }
  0x46   : > { %s2065_s10 = sadd.s32 1, %s1917_s27   ;;  %s32_s13 = sadd.s32 1, %s1913_s26 }
  0x47   : > { %s29_s11 = ssub.s32 %s1917_s27, %s2065_s10  ;;  %p39_p8 = scmp.ne.s32.totalorder %s1913_s26, %s1909_s25 }
  0x48   : > { %p30_p4 = scmp.eq.s32.totalorder %s29_s11, 0  ;;  %p40_p12 = scmp.eq.s32.totalorder %s1917_s27, 0 }
  0x49   : > { %p2234_p3 = scmp.eq.s32.totalorder %s1995_s28, 1  ;;  %p1532_p9 = scmp.lt.s32.totalorder %s1917_s27, 2 }
  0x4a   : > { %s2074_s16 = scalar_select %p30_p4, %s1913_s26, %s32_s13  }
  0x4b   : > { %p41_p6 = por %p40_p12, %p39_p8  ;;  %p2078_p7 = por %p2234_p3, %p39_p8 }
  0x4c   : > { %s277_s12 = sand.u32 1, %s1913_s26   ;;  %s1463_s15 = sshll.u32 %s1917_s27, 8 }
  0x4d   : > { %s2235_s14 = scalar_select %p2078_p7, 1, 0 }
  0x4e   : > { %s1353_s17 = sshll.u32 %s277_s12, 4  ;;  %s2088_s20 = scalar_lea.hbm %s2214_s0, %s1463_s15 }
  0x4f   : > { %s281_s23 = scalar_lea.vmem [#allocation2], %s1353_s17  ;;  %p2092_p11 = pnand %p1532_p9, %p41_p6 }
  0x50   : > { %s288_s29 = sshll.u32 %s281_s23, 4  ;;  %s2096_s13 = scalar_lea.sflag [#allocation3], %s277_s12  ;;  %s2090_s29 = int_to_ptr.vmem [resolvable:$true] %s288_s29 }
  0x51   : > { %s1817_s21 = scalar_lea.hbm %s2088_s20, 256  ;;  %p1819_p0 = pneg %p2092_p11 }
  0x52   : > { %p1818_p13 = scmp.ne.s32.totalorder %s2088_s20, %s1817_s21  ;;  %s1822_s17 = scalar_lea.hbm %s2214_s0, 512 }
  0x53   : > { %p1823_p1 = scmp.lt.s32.totalorder %s2088_s20, %s2214_s0  ;;  %p1824_p2 = scmp.lt.s32.totalorder %s1822_s17, %s1817_s21 }
  0x54   : > { %p1820_p5 = pnand %p1819_p0, %p1818_p13 }
  0x55   : > { %p1825_p4 = por %p1824_p2, %p1823_p1 }
  0x56   : > { %p1821_p10 = pneg %p1820_p5 }
  0x58   : > { %p1826_p8 = pnand %p1825_p4, %p1821_p10 }
  0x5a   : > { %1829 = shalt.err (!%p1826_p8)
}
  0x5b   : > { %s1830_s12 = scalar_lea.vmem %s2090_s29, 256  ;;  %s1929_s22 = smov [#allocation2]  }
  0x5c   : > { %p1831_p12 = scmp.ne.s32.totalorder %s2090_s29, %s1830_s12  ;;  %s1835_s1 = sshll.u32 %s1929_s22, 4  ;;  %s1836_s1 = int_to_ptr.vmem [resolvable:$false] %s1835_s1 }
  0x5d   : > { %s1837_s15 = scalar_lea.vmem %s1836_s1, 512  ;;  %p1838_p9 = scmp.lt.s32.totalorder %s2090_s29, %s1836_s1 }
  0x5e   : > { %p1833_p6 = pnand %p1831_p12, %p1819_p0  ;;  %p1839_p13 = scmp.lt.s32.totalorder %s1837_s15, %s1830_s12 }
  0x60   : > { %p1834_p3 = pneg %p1833_p6  ;;  %p1840_p5 = por %p1839_p13, %p1838_p9 }
  0x62   : > { %p1841_p7 = pnand %p1840_p5, %p1834_p3 }
  0x64   : > { %1844 = shalt.err (!%p1841_p7)
}
  0x65   : > { %s2237_s21 = smov 8   ;;  %s2238_s18 = smov 128  }
  0x66   : > { %1523 = dma.hbm_to_vmem [thread:$0]  (!%p2092_p11), %s2088_s20, 256, %s2090_s29, %s2096_s13, %s2238_s18, %s2238_s18, %s2237_s21  }
  0x67   : > { %p2239_p0 = scmp.ne.s32.totalorder %s2231_s9, 0 }
  0x68   : > { %s2123_s22 = sand.u32 (!%p2239_p0), 1, %s1909_s25   ;;  %p2240_p7 = scmp.ne.s32.totalorder (!%p2239_p0), %s2229_s30, 0 }
  0x69   : > { %300 = sbr.rel (%p2239_p0) target bundleno = 772 (0x304), region = 48  ;;  %s1357_s1 = sshll.u32 (!%p2239_p0), %s2123_s22, 4 }
  0x6a   : > { %s303_s17 = scalar_lea.sflag (!%p2239_p0), [#allocation3], %s2123_s22  ;;  %s306_s11 = scalar_lea.vmem (!%p2239_p0), [#allocation2], %s1357_s1 }
  0x6e   : > { %1888 = dma.done.wait (%p2240_p7), %s303_s17, 256  }
  0x6f   : > { %1890 = vsyncadd (%p2240_p7), %s303_s17, 4294967040  ;;  %p2241_p11 = scmp.eq.s32.totalorder %s1995_s28, 0 }
  0x71   : > { %1892 = dma.done.wait (%p2241_p11), [#allocation6], 1600   ;;  %p2242_p10 = pmov %p2241_p11 }
  0x73   : > { %1894 = vsyncadd (%p2242_p10), [#allocation6], 4294965696  ;;  %p2243_p1 = pmov %p2242_p10 }
  0x75   : > { %1896 = dma.done.wait (%p2243_p1), [#allocation9], 10240   ;;  %p2244_p2 = pmov %p2243_p1 }
  0x76   : > { %v1930_v0 = vmov 0   ;;  %v1583_v1 = vld [vmem:[#allocation5 + $0x44] ss:$16 sps:$4 sm:$0xff]   ;;  %v1585_v2 = vld [vmem:[#allocation5 + $0x40] ss:$16 sps:$4 sm:$0xff]   ;;  %v357_v8 = vld [vmem:[%s306_s11 + $0x8] sm:$0xff] }
  0x77   : > { %1898 = vsyncadd (%p2244_p2), [#allocation9], 4294957056  ;;  %489 = vmatprep.mubr.bf16.mxu1 %v1930_v0  ;;  %467 = vmatprep.subr.bf16.mxu1 %v1583_v1  ;;  %v1586_v3 = vld [vmem:[#allocation5 + $0x24] ss:$16 sps:$4 sm:$0xff]   ;;  %v1588_v4 = vld [vmem:[#allocation5 + $0x20] ss:$16 sps:$4 sm:$0xff]  }
  0x78   : > { %468 = vmatpush1.bf16.msra.mxu1 %v1585_v2  ;;  %v1589_v5 = vld [vmem:[#allocation5 + $0x4] ss:$16 sps:$4 sm:$0xff]   ;;  %v1591_v6 = vld [vmem:[#allocation5] ss:$16 sps:$4 sm:$0xff]   ;;  %v1594_v9 = vld [vmem:[#allocation5 + $0x4c] ss:$16 sps:$4 sm:$0xff]  }
  0x79   : > { %469 = vmatprep.subr.bf16.mxu1 %v1586_v3  ;;  %v356_v7 = vld [vmem:[%s306_s11] sm:$0xff]  ;;  %vm453_vm0 = vcmask 392192   ;;  %v1592_v14 = vld [vmem:[#allocation5 + $0x48] ss:$16 sps:$4 sm:$0xff]   ;;  %v1597_v15 = vld [vmem:[#allocation5 + $0x2c] ss:$16 sps:$4 sm:$0xff]  }
  0x7a   : > { %v1601_v10 = vld [vmem:[#allocation8 + $0x74] ss:$8 sps:$4 sm:$0xff]   ;;  %v1603_v11 = vld [vmem:[#allocation8 + $0x70] ss:$8 sps:$4 sm:$0xff]   ;;  %v358_v12 = vpack.c.bf16 %v357_v8, %v356_v7  ;;  %v1604_v13 = vld [vmem:[#allocation8 + $0x64] ss:$8 sps:$4 sm:$0xff]  }
  0x7b   : > { %951 = vmatprep.subr.bf16.mxu0 %v1601_v10  ;;  %v1606_v16 = vld [vmem:[#allocation8 + $0x60] ss:$8 sps:$4 sm:$0xff]   ;;  %v1607_v17 = vld [vmem:[#allocation8 + $0x54] ss:$8 sps:$4 sm:$0xff]   ;;  %v1609_v20 = vld [vmem:[#allocation8 + $0x50] ss:$8 sps:$4 sm:$0xff]  }
  0x7c   : > { %470 = vmatpush1.bf16.msra.mxu1 %v1588_v4  ;;  %952 = vmatpush1.bf16.msra.mxu0 %v1603_v11  ;;  %v1595_v18 = vld [vmem:[#allocation5 + $0x28] ss:$16 sps:$4 sm:$0xff]   ;;  %v1600_v19 = vld [vmem:[#allocation5 + $0xc] ss:$16 sps:$4 sm:$0xff]   ;;  %s352_s13 = scalar_lea.vmem [#allocation11], %s1357_s1  ;;  %s1464_s23 = sshll.u32 %s1995_s28, 8 }
  0x7d   : > { %471 = vmatprep.subr.bf16.mxu1 %v1589_v5  ;;  %953 = vmatprep.subr.bf16.mxu0 %v1604_v13  ;;  %v1610_v21 = vld [vmem:[#allocation8 + $0x44] ss:$8 sps:$4 sm:$0xff]   ;;  %v1614_v23 = vld [vmem:[#allocation8 + $0x174] ss:$8 sps:$4 sm:$0xff]   ;;  %v1615_v24 = vld [vmem:[#allocation8 + $0x40] ss:$8 sps:$4 sm:$0xff]   ;;  %s2171_s21 = scalar_lea.hbm %s2221_s7, %s1464_s23 }
  0x7e   : > { %v1598_v22 = vld [vmem:[#allocation5 + $0x8] ss:$16 sps:$4 sm:$0xff]   ;;  %v1612_v26 = vld [vmem:[#allocation8 + $0x170] ss:$8 sps:$4 sm:$0xff]   ;;  %v1618_v30 = vld [vmem:[#allocation8 + $0x160] ss:$8 sps:$4 sm:$0xff]  }
  0x7f   : > { %v1616_v25 = vld [vmem:[#allocation8 + $0x34] ss:$8 sps:$4 sm:$0xff]   ;;  %v1620_v27 = vld [vmem:[#allocation8 + $0x164] ss:$8 sps:$4 sm:$0xff]   ;;  %v1621_v28 = vld [vmem:[#allocation8 + $0x30] ss:$8 sps:$4 sm:$0xff]  }
  0x80   : > { %472 = vmatpush1.bf16.msra.mxu1 %v1591_v6  ;;  %954 = vmatpush1.bf16.msra.mxu0 %v1606_v16  ;;  %v1622_v29 = vld [vmem:[#allocation8 + $0x24] ss:$8 sps:$4 sm:$0xff]   ;;  %v1626_v31 = vld [vmem:[#allocation8 + $0x154] ss:$8 sps:$4 sm:$0xff]   ;;  %v1627_v32 = vld [vmem:[#allocation8 + $0x20] ss:$8 sps:$4 sm:$0xff]  }
  0x81   : > { %510 = vmatprep.subr.bf16.mxu1 %v1594_v9  ;;  %955 = vmatprep.subr.bf16.mxu0 %v1607_v17  ;;  %v1628_v33 = vld [vmem:[#allocation8 + $0x14] ss:$8 sps:$4 sm:$0xff]   ;;  %v1624_v34 = vld [vmem:[#allocation8 + $0x150] ss:$8 sps:$4 sm:$0xff]   ;;  %v1632_v35 = vld [vmem:[#allocation8 + $0x144] ss:$8 sps:$4 sm:$0xff]   ;;  %v373_v17 = vlaneseq }
  0x82   : > { %v1633_v36 = vld [vmem:[#allocation8 + $0x10] ss:$8 sps:$4 sm:$0xff]   ;;  %v1634_v37 = vld [vmem:[#allocation8 + $0x4] ss:$8 sps:$4 sm:$0xff]   ;;  %v1630_v38 = vld [vmem:[#allocation8 + $0x140] ss:$8 sps:$4 sm:$0xff]  }
  0x83   : > { %1375 = vmatmul.mubr.msk.bf16.vlgmr.msra.gmra.mxu1 %vm453_vm0, %v358_v12  ;;  %v1638_v39 = vld [vmem:[#allocation8 + $0x134] ss:$8 sps:$4 sm:$0xff]   ;;  %v1639_v40 = vld [vmem:[#allocation8] ss:$8 sps:$4 sm:$0xff]   ;;  %v1636_v42 = vld [vmem:[#allocation8 + $0x130] ss:$8 sps:$4 sm:$0xff]  }
  0x84   : > { %511 = vmatpush1.bf16.msra.mxu1 %v1592_v14  ;;  %532 = vmatprep.mubr.bf16.mxu1 %v1930_v0  ;;  %v1640_v41 = vld [vmem:[#allocation8 + $0xf4] ss:$8 sps:$4 sm:$0xff]   ;;  %v1644_v43 = vld [vmem:[#allocation8 + $0x124] ss:$8 sps:$4 sm:$0xff]   ;;  %v1645_v44 = vld [vmem:[#allocation8 + $0xf0] ss:$8 sps:$4 sm:$0xff]  }
  0x85   : > { %512 = vmatprep.subr.bf16.mxu1 %v1597_v15  ;;  %956 = vmatpush1.bf16.msra.mxu0 %v1609_v20  ;;  %v1646_v45 = vld [vmem:[#allocation8 + $0xe4] ss:$8 sps:$4 sm:$0xff]   ;;  %v1642_v46 = vld [vmem:[#allocation8 + $0x120] ss:$8 sps:$4 sm:$0xff]   ;;  %v1650_v47 = vld [vmem:[#allocation8 + $0x114] ss:$8 sps:$4 sm:$0xff]  }
  0x86   : > { %957 = vmatprep.subr.bf16.mxu0 %v1610_v21  ;;  %v1651_v48 = vld [vmem:[#allocation8 + $0xe0] ss:$8 sps:$4 sm:$0xff]   ;;  %v1652_v49 = vld [vmem:[#allocation8 + $0xd4] ss:$8 sps:$4 sm:$0xff]   ;;  %v1648_v50 = vld [vmem:[#allocation8 + $0x110] ss:$8 sps:$4 sm:$0xff]  }
  0x87   : > { %v1656_v51 = vld [vmem:[#allocation8 + $0x104] ss:$8 sps:$4 sm:$0xff]   ;;  %v1657_v52 = vld [vmem:[#allocation8 + $0xd0] ss:$8 sps:$4 sm:$0xff]   ;;  %v1654_v54 = vld [vmem:[#allocation8 + $0x100] ss:$8 sps:$4 sm:$0xff]  }
  0x88   : > { %513 = vmatpush1.bf16.msra.mxu1 %v1595_v18  ;;  %v1658_v53 = vld [vmem:[#allocation8 + $0xc4] ss:$8 sps:$4 sm:$0xff]   ;;  %v1662_v55 = vld [vmem:[#allocation8 + $0x1f4] ss:$8 sps:$4 sm:$0xff]   ;;  %v1663_v56 = vld [vmem:[#allocation8 + $0xc0] ss:$8 sps:$4 sm:$0xff]  }
  0x89   : > { %514 = vmatprep.subr.bf16.mxu1 %v1600_v19  ;;  %958 = vmatpush1.bf16.msra.mxu0 %v1615_v24  ;;  %v1664_v57 = vld [vmem:[#allocation8 + $0xb4] ss:$8 sps:$4 sm:$0xff]   ;;  %v1660_v58 = vld [vmem:[#allocation8 + $0x1f0] ss:$8 sps:$4 sm:$0xff]   ;;  %v1668_v59 = vld [vmem:[#allocation8 + $0x1e4] ss:$8 sps:$4 sm:$0xff]  }
  0x8a   : > { %959 = vmatprep.subr.bf16.mxu0 %v1616_v25  ;;  %v1669_v60 = vld [vmem:[#allocation8 + $0xb0] ss:$8 sps:$4 sm:$0xff]   ;;  %v1666_v61 = vld [vmem:[#allocation8 + $0x1e0] ss:$8 sps:$4 sm:$0xff]   ;;  %v1670_v62 = vld [vmem:[#allocation8 + $0xa4] ss:$8 sps:$4 sm:$0xff]  }
  0x8b   : > { %v1674_v63 = vld [vmem:[#allocation8 + $0x1d4] ss:$8 sps:$4 sm:$0xff]   ;;  %v1672_v0 = vld [vmem:[#allocation8 + $0x1d0] ss:$8 sps:$4 sm:$0xff]   ;;  %v1675_v1 = vld [vmem:[#allocation8 + $0xa0] ss:$8 sps:$4 sm:$0xff]  }
  0x8c   : > { %515 = vmatpush1.bf16.msra.mxu1 %v1598_v22  ;;  %v1676_v2 = vld [vmem:[#allocation8 + $0x94] ss:$8 sps:$4 sm:$0xff]   ;;  %v1680_v3 = vld [vmem:[#allocation8 + $0x1c4] ss:$8 sps:$4 sm:$0xff]   ;;  %v1678_v4 = vld [vmem:[#allocation8 + $0x1c0] ss:$8 sps:$4 sm:$0xff]  }
  0x8d   : > { %994 = vmatprep.subr.bf16.mxu1 %v1614_v23  ;;  %960 = vmatpush1.bf16.msra.mxu0 %v1621_v28  ;;  %v1681_v5 = vld [vmem:[#allocation8 + $0x90] ss:$8 sps:$4 sm:$0xff]   ;;  %v1682_v6 = vld [vmem:[#allocation8 + $0x84] ss:$8 sps:$4 sm:$0xff]   ;;  %v1686_v7 = vld [vmem:[#allocation8 + $0x1b4] ss:$8 sps:$4 sm:$0xff]  }
  0x8e   : > { %961 = vmatprep.subr.bf16.mxu0 %v1622_v29  ;;  %v1684_v8 = vld [vmem:[#allocation8 + $0x1b0] ss:$8 sps:$4 sm:$0xff]   ;;  %v1687_v9 = vld [vmem:[#allocation8 + $0x80] ss:$8 sps:$4 sm:$0xff]   ;;  %v1690_v10 = vld [vmem:[#allocation8 + $0x1a4] ss:$8 sps:$4 sm:$0xff]  }
  0x8f   : > { %1376 = vmatmul.mubr.msk.bf16.vlgmr.msra.gmra.mxu1 %vm453_vm0, %v358_v12  ;;  %v1688_v11 = vld [vmem:[#allocation8 + $0x1a0] ss:$8 sps:$4 sm:$0xff]   ;;  %v1693_v12 = vld [vmem:[#allocation8 + $0x194] ss:$8 sps:$4 sm:$0xff]   ;;  %v1691_v13 = vld [vmem:[#allocation8 + $0x190] ss:$8 sps:$4 sm:$0xff]  }
  0x90   : > { %995 = vmatpush1.bf16.msra.mxu1 %v1612_v26  ;;  %v1696_v14 = vld [vmem:[#allocation8 + $0x184] ss:$8 sps:$4 sm:$0xff]   ;;  %v1694_v15 = vld [vmem:[#allocation8 + $0x180] ss:$8 sps:$4 sm:$0xff]   ;;  %v1697_v16 = vld [vmem:[#allocation10 + $0x78] sm:$0xff]   ;;  %v2143_v18 = vshrl.u32 %v373_v17, 7 }
  0x91   : > { %996 = vmatprep.subr.bf16.mxu1 %v1620_v27  ;;  %962 = vmatpush1.bf16.msra.mxu0 %v1627_v32  ;;  %v371_v20 = vld [vmem:[#allocation7] sm:$0xf]  ;;  %s1235_s19 = sshll.u32 %s352_s13, 4  ;;  %s1222_s18 = scalar_lea.sflag [#allocation4], %s2123_s22  ;;  %s2166_s19 = int_to_ptr.vmem [resolvable:$true] %s1235_s19 }
  0x92   : > { %963 = vmatprep.subr.bf16.mxu0 %v1628_v33  ;;  %v379_v19 = vsub.s32 1, %v2143_v18  ;;  %v375_v21 = vsub.s32 0, %v2143_v18  ;;  %s1845_s1 = scalar_lea.vmem %s2166_s19, 256  ;;  %p2245_p8 = scmp.ne.s32.totalorder %s2235_s14, 0 }
  0x93   : > { %p1846_p4 = scmp.ne.s32.totalorder %s2166_s19, %s1845_s1  ;;  %s1931_s28 = smov [#allocation11]  }
  0x94   : > { %997 = vmatpush1.bf16.msra.mxu1 %v1618_v30  ;;  %v380_v23 = vrot.slane %v371_v20, %v379_v19  ;;  %v376_v24 = vrot.slane %v371_v20, %v375_v21  ;;  %s1849_s17 = sshll.u32 %s1931_s28, 4  ;;  %s1850_s17 = int_to_ptr.vmem [resolvable:$false] %s1849_s17 }
  0x95   : > { %998 = vmatprep.subr.bf16.mxu1 %v1626_v31  ;;  %964 = vmatpush1.bf16.msra.mxu0 %v1633_v36  ;;  %p1847_p12 = pnand %p1846_p4, %p2245_p8  ;;  %s1851_s11 = scalar_lea.vmem %s1850_s17, 512 }
  0x96   : > { %965 = vmatprep.subr.bf16.mxu0 %v1634_v37  ;;  %v383_v37 = vsub.s32 2, %v2143_v18  ;;  %p1852_p3 = scmp.lt.s32.totalorder %s2166_s19, %s1850_s17  ;;  %p1853_p9 = scmp.lt.s32.totalorder %s1851_s11, %s1845_s1 }
  0x97   : > { %p1848_p6 = pneg %p1847_p12 }
  0x98   : > { %999 = vmatpush1.bf16.msra.mxu1 %v1624_v34  ;;  %p1854_p13 = por %p1853_p9, %p1852_p3 }
  0x99   : > { %1000 = vmatprep.subr.bf16.mxu1 %v1632_v35  ;;  %966 = vmatpush1.bf16.msra.mxu0 %v1639_v40  ;;  %v387_v35 = vsub.s32 3, %v2143_v18 }
  0x9a   : > { %967 = vmatprep.subr.bf16.mxu0 %v1640_v41  ;;  %p1855_p5 = pnand %p1854_p13, %p1848_p6 }
  0x9c   : > { %1001 = vmatpush1.bf16.msra.mxu1 %v1630_v38 }
  0x9d   : > { %1002 = vmatprep.subr.bf16.mxu1 %v1638_v39  ;;  %968 = vmatpush2.bf16.msra.mxu0 %v1645_v44  ;;  %v1698_v39 = vld [vmem:[#allocation10 + $0x38] sm:$0xff]   ;;  %v384_v44 = vrot.slane %v371_v20, %v383_v37 }
  0x9e   : > { %969 = vmatprep.subr.bf16.mxu0 %v1646_v45 }
  0xa0   : > { %1003 = vmatpush1.bf16.msra.mxu1 %v1636_v42  ;;  %v1699_v42 = vld [vmem:[#allocation10 + $0x70] sm:$0xff]  }
  0xa1   : > { %1004 = vmatprep.subr.bf16.mxu1 %v1644_v43  ;;  %970 = vmatpush2.bf16.msra.mxu0 %v1651_v48  ;;  %v388_v43 = vrot.slane %v371_v20, %v387_v35 }
  0xa2   : > { %971 = vmatprep.subr.bf16.mxu0 %v1652_v49 }
  0xa4   : > { %1005 = vmatpush1.bf16.msra.mxu1 %v1642_v46  ;;  %v1700_v46 = vld [vmem:[#allocation10 + $0x30] sm:$0xff]  }
  0xa5   : > { %1006 = vmatprep.subr.bf16.mxu1 %v1650_v47  ;;  %972 = vmatpush2.bf16.msra.mxu0 %v1657_v52 }
  0xa6   : > { %973 = vmatprep.subr.bf16.mxu0 %v1658_v53 }
  0xa8   : > { %1007 = vmatpush1.bf16.msra.mxu1 %v1648_v50 }
  0xa9   : > { %1008 = vmatprep.subr.bf16.mxu1 %v1656_v51  ;;  %974 = vmatpush2.bf16.msra.mxu0 %v1663_v56 }
  0xaa   : > { %975 = vmatprep.subr.bf16.mxu0 %v1664_v57 }
  0xac   : > { %1009 = vmatpush1.bf16.msra.mxu1 %v1654_v54 }
  0xad   : > { %1010 = vmatprep.subr.bf16.mxu1 %v1662_v55  ;;  %976 = vmatpush2.bf16.msra.mxu0 %v1669_v60  ;;  %v1702_v60 = vld [vmem:[#allocation10 + $0x28] sm:$0xff]  }
  0xae   : > { %977 = vmatprep.subr.bf16.mxu0 %v1670_v62  ;;  %v1704_v62 = vld [vmem:[#allocation10 + $0x20] sm:$0xff]  }
  0xb0   : > { %1011 = vmatpush2.bf16.msra.mxu1 %v1660_v58 }
  0xb1   : > { %1012 = vmatprep.subr.bf16.mxu1 %v1668_v59  ;;  %978 = vmatpush2.bf16.msra.mxu0 %v1675_v1  ;;  %v1701_v59 = vld [vmem:[#allocation10 + $0x68] sm:$0xff]   ;;  %v1707_v1 = vld [vmem:[#allocation10 + $0x50] sm:$0xff]  }
  0xb2   : > { %979 = vmatprep.subr.bf16.mxu0 %v1676_v2  ;;  %v1708_v2 = vld [vmem:[#allocation10 + $0x10] sm:$0xff]  }
  0xb4   : > { %1013 = vmatpush2.bf16.msra.mxu1 %v1666_v61  ;;  %v1703_v61 = vld [vmem:[#allocation10 + $0x60] sm:$0xff]  }
  0xb5   : > { %1014 = vmatprep.subr.bf16.mxu1 %v1674_v63  ;;  %980 = vmatpush2.bf16.msra.mxu0 %v1681_v5  ;;  %v1705_v63 = vld [vmem:[#allocation10 + $0x58] sm:$0xff]   ;;  %v1711_v5 = vld [vmem:[#allocation10 + $0x40] sm:$0xff]  }
  0xb6   : > { %981 = vmatprep.subr.bf16.mxu0 %v1682_v6  ;;  %v1712_v6 = vld [vmem:[#allocation10] sm:$0xff]  }
  0xb8   : > { %1015 = vmatpush2.bf16.msra.mxu1 %v1672_v0  ;;  %v1706_v0 = vld [vmem:[#allocation10 + $0x18] sm:$0xff]  }
  0xb9   : > { %1016 = vmatprep.subr.bf16.mxu1 %v1680_v3  ;;  %982 = vmatpush2.bf16.msra.mxu0 %v1687_v9  ;;  %v1709_v3 = vld [vmem:[#allocation10 + $0x48] sm:$0xff]   ;;  %v619_v9 = vld [vmem:[%s2218_s4] sm:$0x3] }
  0xba   : > { %1465 = vmatprep.subr.bf16.mxu0 %v1697_v16 }
  0xbc   : > { %1017 = vmatpush2.bf16.msra.mxu1 %v1678_v4  ;;  %v1710_v4 = vld [vmem:[#allocation10 + $0x8] sm:$0xff]  }
  0xbd   : > { %1018 = vmatprep.subr.bf16.mxu1 %v1686_v7 }
  0xc0   : > { %1019 = vmatpush2.bf16.msra.mxu1 %v1684_v8 }
  0xc1   : > { %1020 = vmatprep.subr.bf16.mxu1 %v1690_v10 }
  0xc4   : > { %1021 = vmatpush2.bf16.msra.mxu1 %v1688_v11  ;;  %v628_v11 = vrot.slane %v619_v9, %v379_v19 }
  0xc5   : > { %1022 = vmatprep.subr.bf16.mxu1 %v1693_v12  ;;  %v624_v12 = vrot.slane %v619_v9, %v375_v21 }
  0xc8   : > { %1023 = vmatpush2.bf16.msra.mxu1 %v1691_v13 }
  0xc9   : > { %1024 = vmatprep.subr.bf16.mxu1 %v1696_v14 }
  0xcc   : > { %1025 = vmatpush2.bf16.msra.mxu1 %v1694_v15 }
 0x143   : > { %v491_v22 = vpop.f32.mrf.mxu1 }
 0x144   : > { %v492_v29 = vadd.f32 %v491_v22, %v376_v24 }
 0x145   : > { %v493_v25 = vpop.f32.mrf.mxu1 }
 0x146   : > { %v494_v27 = vadd.f32 %v493_v25, %v380_v23  ;;  %v543_v36 = vmax.f32 %v492_v29, 0.0 }
 0x147   : > { %v495_v26 = vpop.f32.mrf.mxu1 }
 0x148   : > { %v496_v28 = vadd.f32 %v495_v26, %v376_v24  ;;  %v544_v33 = vmax.f32 %v494_v27, 0.0 }
 0x149   : > { %v497_v30 = vpop.f32.mrf.mxu1 }
 0x14a   : > { %v498_v31 = vadd.f32 %v497_v30, %v380_v23  ;;  %v547_v32 = vmax.f32 %v496_v28, 0.0 }
 0x14c   : > { %v548_v34 = vmax.f32 %v498_v31, 0.0  ;;  %v551_v40 = vpack.c.bf16 %v547_v32, %v543_v36 }
 0x14e   : > { %v552_v38 = vpack.c.bf16 %v548_v34, %v544_v33  ;;  %v1441_v33 = vld [vmem:[%s2220_s6] ss:$0 sm:$0xff] }
 0x14f   : > { %v534_v41 = vpop.f32.mrf.mxu1 }
 0x150   : > { %983 = vmatprep.mubr.bf16.mxu0 %v552_v38  ;;  %v535_v50 = vadd.f32 %v534_v41, %v384_v44 }
 0x151   : > { %v536_v45 = vpop.f32.mrf.mxu1  ;;  %984 = vmatmul.mubr.bf16.vlgmr.msra.gmra.mxu0 %v551_v40 }
 0x152   : > { %1466 = vmatpush3.bf16.msra.mxu0 %v1698_v39  ;;  %v537_v48 = vadd.f32 %v536_v45, %v388_v43  ;;  %v545_v56 = vmax.f32 %v535_v50, 0.0 }
 0x153   : > { %v538_v47 = vpop.f32.mrf.mxu1  ;;  %1467 = vmatprep.subr.bf16.mxu0 %v1699_v42 }
 0x154   : > { %v539_v49 = vadd.f32 %v538_v47, %v384_v44  ;;  %v546_v54 = vmax.f32 %v537_v48, 0.0 }
 0x155   : > { %v540_v51 = vpop.f32.mrf.mxu1 }
 0x156   : > { %v541_v52 = vadd.f32 %v540_v51, %v388_v43  ;;  %1468 = vmatpush3.bf16.msra.mxu0 %v1700_v46  ;;  %v549_v53 = vmax.f32 %v539_v49, 0.0 }
 0x157   : > { %1469 = vmatprep.subr.bf16.mxu0 %v1701_v59 }
 0x158   : > { %v550_v55 = vmax.f32 %v541_v52, 0.0  ;;  %v553_v58 = vpack.c.bf16 %v549_v53, %v545_v56 }
 0x15a   : > { %v554_v57 = vpack.c.bf16 %v550_v55, %v546_v54  ;;  %1470 = vmatpush3.bf16.msra.mxu0 %v1702_v60 }
 0x15b   : > { %1471 = vmatprep.subr.bf16.mxu0 %v1703_v61 }
 0x15c   : > { %1026 = vmatprep.mubr.bf16.mxu1 %v554_v57 }
 0x15d   : > { %1027 = vmatmul.mubr.bf16.vlgmr.msra.gmra.mxu1 %v553_v58 }
 0x15e   : > { %1472 = vmatpush3.bf16.msra.mxu0 %v1704_v62 }
 0x15f   : > { %1473 = vmatprep.subr.bf16.mxu0 %v1705_v63 }
 0x162   : > { %1474 = vmatpush3.bf16.msra.mxu0 %v1706_v0 }
 0x163   : > { %1475 = vmatprep.subr.bf16.mxu0 %v1707_v1 }
 0x166   : > { %1476 = vmatpush3.bf16.msra.mxu0 %v1708_v2 }
 0x167   : > { %1477 = vmatprep.subr.bf16.mxu0 %v1709_v3 }
 0x16a   : > { %1478 = vmatpush3.bf16.msra.mxu0 %v1710_v4 }
 0x16b   : > { %1479 = vmatprep.subr.bf16.mxu0 %v1711_v5 }
 0x16e   : > { %1480 = vmatpush3.bf16.msra.mxu0 %v1712_v6 }
 0x211   : > { %v985_v7 = vpop.f32.mrf.mxu0 }
 0x212   : > { %v986_v20 = vadd.f32 %v985_v7, %v624_v12 }
 0x213   : > { %v987_v8 = vpop.f32.mrf.mxu0 }
 0x214   : > { %v988_v16 = vadd.f32 %v987_v8, %v628_v11 }
 0x215   : > { %v989_v10 = vpop.f32.mrf.mxu0 }
 0x216   : > { %v990_v17 = vadd.f32 %v989_v10, %v624_v12 }
 0x217   : > { %v991_v14 = vpop.f32.mrf.mxu0 }
 0x218   : > { %v992_v23 = vadd.f32 %v991_v14, %v628_v11 }
 0x21d   : > { %v1028_v13 = vpop.f32.mrf.mxu1 }
 0x21e   : > { %v1029_v26 = vadd.f32 %v1028_v13, %v986_v20 }
 0x21f   : > { %v1030_v15 = vpop.f32.mrf.mxu1 }
 0x220   : > { %v1031_v24 = vadd.f32 %v1030_v15, %v988_v16  ;;  %v1037_v18 = vmax.f32 %v1029_v26, 0.0 }
 0x221   : > { %v1032_v22 = vpop.f32.mrf.mxu1 }
 0x222   : > { %v1033_v25 = vadd.f32 %v1032_v22, %v990_v17  ;;  %v1038_v19 = vmax.f32 %v1031_v24, 0.0 }
 0x223   : > { %v1034_v27 = vpop.f32.mrf.mxu1 }
 0x224   : > { %v1035_v28 = vadd.f32 %v1034_v27, %v992_v23  ;;  %v1039_v29 = vmax.f32 %v1033_v25, 0.0 }
 0x226   : > { %v1040_v30 = vmax.f32 %v1035_v28, 0.0  ;;  %v1041_v31 = vpack.c.bf16 %v1039_v29, %v1037_v18 }
 0x228   : > { %v1042_v21 = vpack.c.bf16 %v1040_v30, %v1038_v19 }
 0x22a   : > { %1210 = vmatprep.mubr.bf16.mxu0 %v1042_v21 }
 0x22b   : > { %1211 = vmatmul.mubr.bf16.vlgmr.msra.gmra.mxu0 %v1041_v31 }
 0x2eb   : > { %v1481_v32 = vpop.f32.mrf.mxu0 }
 0x2ed   : > { %v1482_v34 = vpop.f32.mrf.mxu0 }
 0x2ee   : > { %v1483_v35 = vadd.f32 %v1482_v34, %v1481_v32 }
 0x2ef   : > { %v1484_v36 = vpop.f32.mrf.mxu0 }
 0x2f0   : > { %v1213_v37 = vadd.f32 %v1483_v35, %v1441_v33 }
 0x2f1   : > { %v1485_v38 = vpop.f32.mrf.mxu0 }
 0x2f2   : > { %1219 = vst [vmem:[%s352_s13] sm:$0xff] %v1213_v37  ;;  %v1486_v39 = vadd.f32 %v1485_v38, %v1484_v36 }
 0x2f4   : > { %v1216_v40 = vadd.f32 %v1486_v39, %v1441_v33 }
 0x2f6   : > { %1220 = vst [vmem:[%s352_s13 + $0x8] sm:$0xff] %v1216_v40 }
 0x2f7   : > { %1858 = shalt.err (!%p1855_p5)
}
 0x2f8   : > { %s1859_s30 = scalar_lea.hbm %s2171_s21, 256  ;;  %s1863_s29 = scalar_lea.hbm %s2221_s7, 512 }
 0x2f9   : > { %p1860_p0 = scmp.ne.s32.totalorder %s2171_s21, %s1859_s30  ;;  %p1864_p10 = scmp.lt.s32.totalorder %s2171_s21, %s2221_s7 }
 0x2fa   : > { %p1865_p1 = scmp.lt.s32.totalorder %s1863_s29, %s1859_s30 }
 0x2fb   : > { %p1861_p7 = pnand %p1860_p0, %p2245_p8 }
 0x2fc   : > { %p1866_p2 = por %p1865_p1, %p1864_p10 }
 0x2fd   : > { %p1862_p11 = pneg %p1861_p7 }
 0x2ff   : > { %p1867_p4 = pnand %p1866_p2, %p1862_p11 }
 0x301   : > { %1870 = shalt.err (!%p1867_p4)
}
 0x302   : > { %s1932_s12 = smov 128   ;;  %s1933_s15 = smov 8  }
 0x303   : > { %1505 = dma.vmem_to_hbm [thread:$0]  (%p2245_p8), %s2166_s19, 256, %s2171_s21, %s1222_s18, %s1932_s12, %s1932_s12, %s1933_s15  }
 0x304 PF: > { %s1250_s1 = sand.u32 1, %s1905_s24   ;;  %p2246_p12 = scmp.ne.s32.totalorder %s2230_s8, 0 }
 0x305   : > { %p2247_p6 = scmp.ge.s32.totalorder %s1917_s27, 2  ;;  %s1251_s28 = scalar_lea.sflag [#allocation4], %s1250_s1 }
 0x307   : > { %p1525_p3 = pnand %p2247_p6, %p2246_p12 }
 0x309   : > { %p1526_p9 = pneg %p1525_p3 }
 0x30b   : > { %1900 = dma.done.wait (%p1526_p9), %s1251_s28, 256  }
 0x30c   : > { %1902 = vsyncadd (%p1526_p9), %s1251_s28, 4294967040  ;;  %p22_p13 = scmp.ge.s32.totalorder %s2065_s10, 4   ;;  %s2248_s24 = smov %s1909_s25 }
 0x30d   : > { %s2249_s25 = smov %s1913_s26  ;;  %s2250_s26 = smov %s2074_s16 }
 0x30e   : > { %s2251_s27 = smov %s2065_s10  ;;  %24 = sbr.rel (!%p22_p13) target bundleno = 9 (0x9), region = 109 }
 0x313   :  { %1256 = vsyncpa [#allocation3], 1 }
 0x314   :  { %1258 = vsyncpa [#allocation3 + $0x1], 1 }
 0x315   :  { %1259 = vsyncpa [#allocation6], 1 }
 0x316   :  { %1260 = vsyncpa [#allocation9], 1 }
 0x317   :  { %1261 = vsyncpa [#allocation4], 1 }
 0x318   :  { %1263 = vsyncpa [#allocation4 + $0x1], 1 }

</bundles_post_ra>
